<compile_context>
chip_gen: v7x
topology: tpu7x:2x2x1
jax: 0.10.0
libtpu: 0.0.40
codegen_flags: <defaults>
</compile_context>

<pallas_src>
import functools
import math

import jax
import jax.numpy as jnp
from jax.experimental import pallas as pl
from jax.experimental.pallas import tpu as pltpu

LANE = 128


def _round_up(x, m):
    return ((x + m - 1) // m) * m


def _fold_factor(seq_len, in_ch):
    """Largest f dividing L with f*C <= 128 (lane fold). f=1 when C >= 128."""
    if in_ch >= LANE:
        return 1
    return max(1, math.gcd(int(seq_len), LANE // int(in_ch)))


def _vmem_budget():
    """(tile budget, vmem_limit_bytes) derived from this generation's physical VMEM."""
    phys = None
    try:
        phys = getattr(pltpu.get_tpu_info(), "vmem_capacity_bytes", None)
    except Exception:
        phys = None
    if not phys:
        phys = 64 * 1024 * 1024  # conservative default (v7x per-TC VMEM)
    phys = int(phys)
    budget = int(phys * 0.70)          # tile-sizing budget, headroom for compiler internals
    vmem_limit = int(phys * 0.85)      # scoped VMEM limit handed to Mosaic
    return budget, vmem_limit


def _choose_tiles(B, Lf, Cf, npad, x_itemsize, budget):
    """Largest (tb, tl) fitting the VMEM budget; tb mult-of-8, tl == Lf or mult-of-8 divisor."""
    lane_c = _round_up(Cf, LANE)
    # Resident weight + bias (count both pipeline buffers to stay conservative).
    fixed = 2 * (_round_up(Cf, 8) * npad + 8 * npad) * 4

    def per_row(tl):
        x_b = 2 * _round_up(tl, 8) * lane_c * x_itemsize   # double-buffered x tile
        o_b = 2 * npad * 4                                  # double-buffered out tile
        a_b = lane_c * 4                                    # f32 accumulator scratch
        return x_b + o_b + a_b

    b_cap = _round_up(B, 8)
    cands = [Lf] + sorted((d for d in range(8, Lf, 8) if Lf % d == 0), reverse=True)

    for tl in cands:
        rows = (budget - fixed) // per_row(tl)
        tb = min(b_cap, (rows // 8) * 8)
        if tb >= 8:
            return int(tb), int(tl)
    return 8, int(cands[-1])  # smallest sensible tiles (budget formula was conservative)


def _cls_kernel(x_ref, w_ref, b_ref, o_ref, acc_ref, *, inv_len):
    # x_ref: (TB, TL, Cf)  w_ref: (Cf, NPAD)  b_ref: (1, NPAD)  o_ref: (TB, NPAD)
    # acc_ref: (TB, Cf) f32 scratch, resident across the L-reduction grid axis.
    l = pl.program_id(1)

    @pl.when(l == 0)
    def _():
        acc_ref[...] = jnp.zeros_like(acc_ref)

    # Upcast at load (input may be bf16; v5e has no bf16 VALU path) and accumulate in f32.
    acc_ref[...] += jnp.sum(x_ref[...].astype(jnp.float32), axis=1)

    @pl.when(l == pl.num_programs(1) - 1)
    def _():
        pooled = acc_ref[...] * inv_len                      # mean over original L
        o_ref[...] = (
            jnp.dot(pooled, w_ref[...], preferred_element_type=jnp.float32)
            + b_ref[...]
        )


def build_params(key, in_ch, num_classes, seq_len):
    """torch.nn.Linear-style init (+/- 1/sqrt(fan_in)).  Kernel weights are pre-transposed,
    zero-padded to a lane-dense (Cf, NPAD) layout and replicated for the lane fold, once."""
    kw, kb = jax.random.split(key)
    lim = 1.0 / math.sqrt(float(in_ch))
    w = jax.random.uniform(kw, (num_classes, in_ch), jnp.float32, -lim, lim)  # torch layout
    b = jax.random.uniform(kb, (num_classes,), jnp.float32, -lim, lim)

    f = _fold_factor(seq_len, in_ch)
    npad = _round_up(num_classes, LANE)
    w_pad = jnp.zeros((in_ch, npad), jnp.float32).at[:, :num_classes].set(w.T)
    w_rep = jnp.tile(w_pad, (f, 1))                       # (f*in_ch, NPAD), one-time
    b_pad = jnp.zeros((1, npad), jnp.float32).at[0, :num_classes].set(b)
    return w, b, w_rep, b_pad


def classifer_forward(x, w_rep, b_pad, num_classes):
    """x: (B, L, in_ch) float32/bfloat16 -> (B, num_classes) float32."""
    B, L, C = x.shape
    npad = w_rep.shape[1]

    # Lane fold: free row-major reshape; weight was replicated to match at build time.
    f = _fold_factor(L, C)
    Lf, Cf = L // f, C * f
    assert w_rep.shape[0] == Cf, "w_rep was built for a different sequence length / fold"
    if f > 1:
        x = x.reshape(B, Lf, Cf)

    budget, vmem_limit = _vmem_budget()
    tb, tl = _choose_tiles(B, Lf, Cf, npad, x.dtype.itemsize, budget)

    b_rows = _round_up(B, tb)          # output rows padded to the tile; x is NOT padded:
    nb, nl = b_rows // tb, Lf // tl    # last partial batch tile reads OOB rows whose outputs
                                       # land in padded rows and are sliced off (rows are
                                       # independent — no cross-row reduction in this kernel).

    kernel = functools.partial(_cls_kernel, inv_len=1.0 / float(L))

    out = pl.pallas_call(
        kernel,
        out_shape=jax.ShapeDtypeStruct((b_rows, npad), jnp.float32),
        grid=(nb, nl),
        in_specs=[
            pl.BlockSpec((tb, tl, Cf), lambda i, l: (i, l, 0)),   # x tiled over batch and L
            pl.BlockSpec((Cf, npad), lambda i, l: (0, 0)),        # weights resident
            pl.BlockSpec((1, npad), lambda i, l: (0, 0)),         # bias resident
        ],
        out_specs=pl.BlockSpec((tb, npad), lambda i, l: (i, 0)),  # lane-dense output tile
        scratch_shapes=[pltpu.VMEM((tb, Cf), jnp.float32)],       # pooled-sum accumulator
        compiler_params=pltpu.CompilerParams(
            dimension_semantics=("parallel", "arbitrary"),
            vmem_limit_bytes=vmem_limit,
        ),
    )(x, w_rep, b_pad)

    return out[:B, :num_classes]


if __name__ == "__main__":
    # Small shapes consistent with the module: batch=8, seq=16, in_ch=32, num_classes=10.
    B, L, in_ch, num_classes = 8, 16, 32, 10

    key = jax.random.PRNGKey(0)
    kx, kp = jax.random.split(key)
    x = jax.random.normal(kx, (B, L, in_ch), jnp.float32)
    w, b, w_rep, b_pad = build_params(kp, in_ch, num_classes, L)

    y = classifer_forward(x, w_rep, b_pad, num_classes)
    jax.block_until_ready(y)

    # Pure-JAX reference: mean over L, then Linear (torch weight layout).
    ref = jnp.mean(x, axis=1) @ w.T + b
    assert y.shape == (B, num_classes)
    assert jnp.allclose(y, ref, atol=1e-5, rtol=1e-5), "mismatch vs reference"

    print("KERNEL_OK")
</pallas_src>

<mosaic_0001>
module attributes {stable_mosaic.version = 11 : i64} {
  func.func @_cls_kernel(%arg0: i32, %arg1: i32, %arg2: memref<8x4x128xf32, #tpu.memory_space<vmem>>, %arg3: memref<128x128xf32, #tpu.memory_space<vmem>>, %arg4: memref<1x128xf32, #tpu.memory_space<vmem>>, %arg5: memref<8x128xf32, #tpu.memory_space<vmem>>, %arg6: memref<8x128xf32, #tpu.memory_space<vmem>>) attributes {dimension_semantics = [#tpu.dimension_semantics<parallel>, #tpu.dimension_semantics<arbitrary>], iteration_bounds = array<i64: 1, 1>, scalar_prefetch = 0 : i64, scratch_operands = 1 : i64, tpu.core_type = #tpu.core_type<tc>, window_params = [{transform_indices = @transform_0, window_bounds = array<i64: 8, 4, 128>}, {pipeline_mode = #tpu.pipeline_mode<synchronous>, transform_indices = @transform_1, window_bounds = array<i64: 128, 128>}, {pipeline_mode = #tpu.pipeline_mode<synchronous>, transform_indices = @transform_2, window_bounds = array<i64: 1, 128>}, {transform_indices = @transform_3, window_bounds = array<i64: 8, 128>}]} {
    %c0_i32 = arith.constant 0 : i32
    %0 = arith.cmpi eq, %arg1, %c0_i32 : i32
    %1 = arith.extui %0 : i1 to i32
    %c0_i32_0 = arith.constant 0 : i32
    %2 = arith.cmpi ne, %1, %c0_i32_0 : i32
    scf.if %2 {
      %cst_9 = arith.constant 0.000000e+00 : f32
      %11 = vector.broadcast %cst_9 : f32 to vector<8x128xf32>
      %c0_10 = arith.constant 0 : index
      %c0_11 = arith.constant 0 : index
      %12 = vector.load %arg6[%c0_10, %c0_11] : memref<8x128xf32, #tpu.memory_space<vmem>>, vector<8x128xf32>
      tpu.vector_store %arg6[%c0_10, %c0_11], %11 {strides = array<i32>} : memref<8x128xf32, #tpu.memory_space<vmem>>, vector<8x128xf32>,
    } else {
    }
    %c0 = arith.constant 0 : index
    %c0_1 = arith.constant 0 : index
    %3 = vector.load %arg6[%c0, %c0_1] : memref<8x128xf32, #tpu.memory_space<vmem>>, vector<8x128xf32>
    %c0_2 = arith.constant 0 : index
    %c0_3 = arith.constant 0 : index
    %c0_4 = arith.constant 0 : index
    %4 = vector.load %arg2[%c0_2, %c0_3, %c0_4] : memref<8x4x128xf32, #tpu.memory_space<vmem>>, vector<8x4x128xf32>
    %cst = arith.constant dense<0.000000e+00> : vector<8x128xf32>
    %5 = vector.multi_reduction <add>, %4, %cst [1] : vector<8x4x128xf32> to vector<8x128xf32>
    %6 = arith.addf %3, %5 : vector<8x128xf32>
    %c0_5 = arith.constant 0 : index
    %c0_6 = arith.constant 0 : index
    %7 = vector.load %arg6[%c0_5, %c0_6] : memref<8x128xf32, #tpu.memory_space<vmem>>, vector<8x128xf32>
    tpu.vector_store %arg6[%c0_5, %c0_6], %6 {strides = array<i32>} : memref<8x128xf32, #tpu.memory_space<vmem>>, vector<8x128xf32>,
    %c0_i32_7 = arith.constant 0 : i32
    %8 = arith.cmpi eq, %arg1, %c0_i32_7 : i32
    %9 = arith.extui %8 : i1 to i32
    %c0_i32_8 = arith.constant 0 : i32
    %10 = arith.cmpi ne, %9, %c0_i32_8 : i32
    scf.if %10 {
      %c0_9 = arith.constant 0 : index
      %c0_10 = arith.constant 0 : index
      %11 = vector.load %arg6[%c0_9, %c0_10] : memref<8x128xf32, #tpu.memory_space<vmem>>, vector<8x128xf32>
      %cst_11 = arith.constant 6.250000e-02 : f32
      %12 = vector.broadcast %cst_11 : f32 to vector<8x128xf32>
      %13 = arith.mulf %11, %12 : vector<8x128xf32>
      %c0_12 = arith.constant 0 : index
      %c0_13 = arith.constant 0 : index
      %14 = vector.load %arg3[%c0_12, %c0_13] : memref<128x128xf32, #tpu.memory_space<vmem>>, vector<128x128xf32>
      %cst_14 = arith.constant dense<0.000000e+00> : vector<8x128xf32>
      %15 = tpu.matmul %13, %14, %cst_14 {dimension_numbers = #tpu.dot_dimension_numbers<[1], [0], [0], [1], [0, 0, 1, 1], [], []>} : vector<8x128xf32>, vector<128x128xf32>, vector<8x128xf32> -> vector<8x128xf32>
      %c0_15 = arith.constant 0 : index
      %c0_16 = arith.constant 0 : index
      %16 = vector.load %arg4[%c0_15, %c0_16] : memref<1x128xf32, #tpu.memory_space<vmem>>, vector<1x128xf32>
      %17 = vector.broadcast %16 : vector<1x128xf32> to vector<8x128xf32>
      %18 = arith.addf %15, %17 : vector<8x128xf32>
      %c0_17 = arith.constant 0 : index
      %c0_18 = arith.constant 0 : index
      %19 = vector.load %arg5[%c0_17, %c0_18] : memref<8x128xf32, #tpu.memory_space<vmem>>, vector<8x128xf32>
      tpu.vector_store %arg5[%c0_17, %c0_18], %18 {strides = array<i32>} : memref<8x128xf32, #tpu.memory_space<vmem>>, vector<8x128xf32>,
    } else {
    }
    return
  }
  func.func @transform_0(%arg0: i32, %arg1: i32) -> (i32, i32, i32) {
    %c0_i32 = arith.constant 0 : i32
    %c0_i32_0 = arith.constant 0 : i32
    return %arg0, %arg1, %c0_i32 : i32, i32, i32
  }
  func.func @transform_1(%arg0: i32, %arg1: i32) -> (i32, i32) {
    %c0_i32 = arith.constant 0 : i32
    %c0_i32_0 = arith.constant 0 : i32
    %c0_i32_1 = arith.constant 0 : i32
    return %c0_i32, %c0_i32_0 : i32, i32
  }
  func.func @transform_2(%arg0: i32, %arg1: i32) -> (i32, i32) {
    %c0_i32 = arith.constant 0 : i32
    %c0_i32_0 = arith.constant 0 : i32
    %c0_i32_1 = arith.constant 0 : i32
    return %c0_i32, %c0_i32_0 : i32, i32
  }
  func.func @transform_3(%arg0: i32, %arg1: i32) -> (i32, i32) {
    %c0_i32 = arith.constant 0 : i32
    %c0_i32_0 = arith.constant 0 : i32
    return %arg0, %c0_i32 : i32, i32
  }
}

</mosaic_0001>

<bundles_post_ra>
// kernel: tpu_custom_call.1
= control target key start
LH: loop header
LB: loop body
LE: loop exit
PB: predicated region body
PF: predicated region fallthrough
CT: control target
= control target key end

     0   :  { %8 = vsyncpa [#allocation4], 0  ;;  %s515_s0 = inlined_call_operand.hbm [shape: f32[8,4,128], index: 0, kind: input, shape index: {}]   ;;  %s516_s1 = inlined_call_operand.hbm [shape: f32[128,128], index: 1, kind: input, shape index: {}]   ;;  %s517_s2 = inlined_call_operand.vmem [shape: f32[1,128], index: 2, kind: input, shape index: {}]   ;;  %s518_s3 = inlined_call_operand.hbm [shape: f32[8,128], index: 3, kind: output, shape index: {}]  }
   0x1   :  { %9 = vsyncpa [#allocation7], 0 }
   0x2   :  { %10 = vsyncpa [#allocation5], 0  ;;  %s413_s12 = smov [#allocation3]   ;;  %s341_s16 = scalar_lea.hbm %s515_s0, 512 }
   0x3   :  { %s16_s13 = sshll.u32 %s413_s12, 4  ;;  %p342_p0 = scmp.ne.s32.totalorder %s515_s0, %s341_s16  ;;  %s17_s13 = int_to_ptr.vmem [resolvable:$true] %s16_s13 }
   0x4   :  { %p345_p1 = scmp.lt.u32.totalorder %s341_s16, %s515_s0 }
   0x6   :  { %p347_p2 = pnand %p345_p1, %p342_p0 }
   0x8   :  { %350 = shalt.err (!%p347_p2)
}
   0x9   :  { %s351_s21 = scalar_lea.vmem %s17_s13, 512  ;;  %p356_p4 = scmp.lt.s32.totalorder %s17_s13, %s17_s13 }
   0xa   :  { %p352_p3 = scmp.ne.s32.totalorder %s17_s13, %s351_s21  ;;  %p357_p5 = scmp.lt.s32.totalorder %s351_s21, %s351_s21 }
   0xc   :  { %p358_p6 = por %p357_p5, %p356_p4 }
   0xe   :  { %p359_p7 = pnand %p358_p6, %p352_p3 }
  0x10   :  { %362 = shalt.err (!%p359_p7)
}
  0x11   :  { %s414_s22 = smov 64   ;;  %s415_s23 = smov 4  }
  0x12   :  { %22 = dma.hbm_to_vmem [thread:$0]  %s515_s0, 512, %s17_s13, [#allocation4], %s414_s22, %s414_s22, %s415_s23  }
  0x13   :  { %s416_s26 = smov [#allocation6]   ;;  %s363_s30 = scalar_lea.hbm %s516_s1, 2048 }
  0x14   :  { %s28_s27 = sshll.u32 %s416_s26, 4  ;;  %p364_p8 = scmp.ne.s32.totalorder %s516_s1, %s363_s30  ;;  %s29_s27 = int_to_ptr.vmem [resolvable:$true] %s28_s27 }
  0x15   :  { %p367_p9 = scmp.lt.u32.totalorder %s363_s30, %s516_s1 }
  0x17   :  { %p369_p10 = pnand %p367_p9, %p364_p8 }
  0x19   :  { %372 = shalt.err (!%p369_p10)
}
  0x1a   :  { %s373_s8 = scalar_lea.vmem %s29_s27, 2048  ;;  %p378_p12 = scmp.lt.s32.totalorder %s29_s27, %s29_s27 }
  0x1b   :  { %p374_p11 = scmp.ne.s32.totalorder %s29_s27, %s373_s8  ;;  %p379_p13 = scmp.lt.s32.totalorder %s373_s8, %s373_s8 }
  0x1d   :  { %p380_p0 = por %p379_p13, %p378_p12 }
  0x1f   :  { %p381_p1 = pnand %p380_p0, %p374_p11 }
  0x21   :  { %384 = shalt.err (!%p381_p1)
}
  0x22   :  { %s417_s0 = smov 128   ;;  %s418_s9 = smov 8  }
  0x23   :  { %34 = dma.hbm_to_vmem [thread:$0]  %s516_s1, 2048, %s29_s27, [#allocation7], %s417_s0, %s417_s0, %s418_s9  }
  0x24   :  { %407 = dma.done.wait [#allocation4], 512  }
  0x25   :  { %408 = vsyncadd [#allocation4], 4294966784 }
  0x26   :  { %409 = dma.done.wait [#allocation7], 2048  }
  0x27   :  { %410 = vsyncadd [#allocation7], 4294965248  ;;  %v419_v0 = vmov 0.0|0.0   ;;  %vm420_vm0 = vmmov 0   ;;  %v421_v1 = vmov 0.0   ;;  %v144_v2 = vld [vmem:[#allocation6] sm:$0xff] }
  0x28   :  { %307 = vmatprep.subr.bf16.mxu0 %v419_v0  ;;  %304 = vmatprep.mubr.msk.f32.mxu0 %vm420_vm0, %v421_v1  ;;  %v145_v3 = vld [vmem:[#allocation6 + $0x8] sm:$0xff]  ;;  %v146_v4 = vld [vmem:[#allocation6 + $0x10] sm:$0xff]  ;;  %v147_v6 = vld [vmem:[#allocation6 + $0x18] sm:$0xff]  ;;  %vm57_vm1 = vcmask 1043456   ;;  %vm122_vm2 = vcmask 1041409   ;;  %vm124_vm3 = vcmask 1042434  }
  0x29   :  { %v308_v5 = vpack.c.bf16 %v145_v3, %v144_v2  ;;  %v148_v7 = vld [vmem:[#allocation6 + $0x20] sm:$0xff]  ;;  %v149_v8 = vld [vmem:[#allocation6 + $0x28] sm:$0xff]  ;;  %v311_v9 = vpack.c.bf16 %v147_v6, %v146_v4  ;;  %v150_v10 = vld [vmem:[#allocation6 + $0x30] sm:$0xff]  ;;  %vm126_vm4 = vcmask 1043459   ;;  %vm128_vm5 = vcmask 1044484   ;;  %s422_s13 = smov [#allocation8]  }
  0x2a   :  { %v151_v11 = vld [vmem:[#allocation6 + $0x38] sm:$0xff]  ;;  %v468_v12 = vld [vmem:[#allocation6 + $0x40] sm:$0xff]  ;;  %v471_v13 = vld [vmem:[#allocation6 + $0x48] sm:$0xff]  ;;  %v314_v21 = vpack.c.bf16 %v149_v8, %v148_v7  ;;  %vm130_vm6 = vcmask 1045509   ;;  %vm132_vm7 = vcmask 1046534   ;;  %vm134_vm8 = vcmask 1047559  }
  0x2b   :  { %309 = vmatpush3.bf16.msra.mxu0 %v308_v5  ;;  %v473_v14 = vld [vmem:[#allocation6 + $0x50] sm:$0xff]  ;;  %v475_v15 = vld [vmem:[#allocation6 + $0x58] sm:$0xff]  ;;  %v49_v16 = vld [vmem:[#allocation3] sm:$0xf]  ;;  %v317_v22 = vpack.c.bf16 %v151_v11, %v150_v10  ;;  %v320_v23 = vpack.c.bf16 %v471_v13, %v468_v12  ;;  %s244_s14 = sshll.u32 %s422_s13, 4  ;;  %s245_s14 = int_to_ptr.vmem [resolvable:$true] %s244_s14 }
  0x2c   :  { %310 = vmatprep.subr.bf16.mxu0 %v419_v0  ;;  %v50_v17 = vld [vmem:[#allocation3 + $0x4] sm:$0xf]  ;;  %v51_v18 = vld [vmem:[#allocation3 + $0x8] sm:$0xf]  ;;  %v52_v19 = vld [vmem:[#allocation3 + $0xc] sm:$0xf]  ;;  %v323_v24 = vpack.c.bf16 %v475_v15, %v473_v14  ;;  %p390_p3 = scmp.lt.s32.totalorder %s245_s14, %s245_s14 }
  0x2d   :  { %v53_v20 = vld [vmem:[#allocation3 + $0x10] sm:$0xf]  ;;  %v54_v25 = vld [vmem:[#allocation3 + $0x14] sm:$0xf]  ;;  %v55_v26 = vld [vmem:[#allocation3 + $0x18] sm:$0xf] }
  0x2e   :  { %v56_v27 = vld [vmem:[#allocation3 + $0x1c] sm:$0xf]  ;;  %v58_v28 = vsel %vm57_vm1, %v49_v16, 0.0  ;;  %v65_v29 = vsel %vm57_vm1, %v50_v17, 0.0  ;;  %v72_v30 = vsel %vm57_vm1, %v51_v18, 0.0  ;;  %v79_v31 = vsel %vm57_vm1, %v52_v19, 0.0 }
  0x2f   :  { %312 = vmatpush3.bf16.msra.mxu0 %v311_v9  ;;  %v59_v32 = vrot.slane %v58_v28, 4  ;;  %v66_v33 = vrot.slane %v65_v29, 4  ;;  %v73_v34 = vrot.slane %v72_v30, 4  ;;  %v80_v35 = vrot.slane %v79_v31, 4  ;;  %v156_v13 = vld [vmem:[#allocation6 + $0x60] sm:$0xff]  ;;  %v157_v16 = vld [vmem:[#allocation6 + $0x68] sm:$0xff] }
  0x30   :  { %313 = vmatprep.subr.bf16.mxu0 %v419_v0  ;;  %v86_v36 = vsel %vm57_vm1, %v53_v20, 0.0  ;;  %v93_v37 = vsel %vm57_vm1, %v54_v25, 0.0  ;;  %v100_v38 = vsel %vm57_vm1, %v55_v26, 0.0  ;;  %v107_v39 = vsel %vm57_vm1, %v56_v27, 0.0  ;;  %s385_s15 = scalar_lea.vmem %s245_s14, 128 }
  0x31   :  { %v60_v40 = vadd.f32 %v59_v32, %v58_v28  ;;  %v67_v41 = vadd.f32 %v66_v33, %v65_v29  ;;  %v74_v42 = vadd.f32 %v73_v34, %v72_v30  ;;  %v81_v43 = vadd.f32 %v80_v35, %v79_v31  ;;  %v158_v28 = vld [vmem:[#allocation6 + $0x70] sm:$0xff]  ;;  %v159_v29 = vld [vmem:[#allocation6 + $0x78] sm:$0xff]  ;;  %p386_p2 = scmp.ne.s32.totalorder %s245_s14, %s385_s15  ;;  %p391_p4 = scmp.lt.s32.totalorder %s385_s15, %s385_s15 }
  0x32   :  { %v87_v44 = vrot.slane %v86_v36, 4  ;;  %v94_v45 = vrot.slane %v93_v37, 4  ;;  %v101_v46 = vrot.slane %v100_v38, 4  ;;  %v108_v47 = vrot.slane %v107_v39, 4 }
  0x33   :  { %315 = vmatpush3.bf16.msra.mxu0 %v314_v21  ;;  %v61_v48 = vrot.slane %v60_v40, 2  ;;  %v68_v49 = vrot.slane %v67_v41, 2  ;;  %v75_v50 = vrot.slane %v74_v42, 2  ;;  %v82_v51 = vrot.slane %v81_v43, 2  ;;  %p392_p5 = por %p391_p4, %p390_p3 }
  0x34   :  { %316 = vmatprep.subr.bf16.mxu0 %v419_v0  ;;  %v88_v52 = vadd.f32 %v87_v44, %v86_v36  ;;  %v95_v53 = vadd.f32 %v94_v45, %v93_v37  ;;  %v102_v54 = vadd.f32 %v101_v46, %v100_v38  ;;  %v109_v55 = vadd.f32 %v108_v47, %v107_v39 }
  0x35   :  { %v62_v56 = vadd.f32 %v61_v48, %v60_v40  ;;  %v69_v57 = vadd.f32 %v68_v49, %v67_v41  ;;  %v76_v58 = vadd.f32 %v75_v50, %v74_v42  ;;  %v83_v59 = vadd.f32 %v82_v51, %v81_v43  ;;  %p393_p6 = pnand %p392_p5, %p386_p2 }
  0x36   :  { %v89_v60 = vrot.slane %v88_v52, 2  ;;  %v96_v61 = vrot.slane %v95_v53, 2  ;;  %v103_v62 = vrot.slane %v102_v54, 2  ;;  %v110_v63 = vrot.slane %v109_v55, 2 }
  0x37   :  { %318 = vmatpush3.bf16.msra.mxu0 %v317_v22  ;;  %v63_v1 = vrot.slane %v62_v56, 1  ;;  %v70_v2 = vrot.slane %v69_v57, 1  ;;  %v77_v3 = vrot.slane %v76_v58, 1  ;;  %v84_v4 = vrot.slane %v83_v59, 1 }
  0x38   :  { %319 = vmatprep.subr.bf16.mxu0 %v419_v0  ;;  %v90_v5 = vadd.f32 %v89_v60, %v88_v52  ;;  %v97_v6 = vadd.f32 %v96_v61, %v95_v53  ;;  %v104_v7 = vadd.f32 %v103_v62, %v102_v54  ;;  %v111_v8 = vadd.f32 %v110_v63, %v109_v55 }
  0x39   :  { %v64_v9 = vadd.f32 %v63_v1, %v62_v56  ;;  %v71_v10 = vadd.f32 %v70_v2, %v69_v57  ;;  %v78_v11 = vadd.f32 %v77_v3, %v76_v58  ;;  %v85_v12 = vadd.f32 %v84_v4, %v83_v59 }
  0x3a   :  { %v91_v17 = vrot.slane %v90_v5, 1  ;;  %v98_v18 = vrot.slane %v97_v6, 1  ;;  %v105_v19 = vrot.slane %v104_v7, 1  ;;  %v112_v20 = vrot.slane %v111_v8, 1 }
  0x3b   :  { %321 = vmatpush3.bf16.msra.mxu0 %v320_v23  ;;  %v123_v21 = vsel %vm122_vm2, %v71_v10, %v64_v9  ;;  %v326_v23 = vpack.c.bf16 %v157_v16, %v156_v13  ;;  %v329_v34 = vpack.c.bf16 %v159_v29, %v158_v28 }
  0x3c   :  { %322 = vmatprep.subr.bf16.mxu0 %v419_v0  ;;  %v92_v22 = vadd.f32 %v91_v17, %v90_v5  ;;  %v99_v25 = vadd.f32 %v98_v18, %v97_v6  ;;  %v106_v26 = vadd.f32 %v105_v19, %v104_v7  ;;  %v125_v27 = vsel %vm124_vm3, %v78_v11, %v123_v21 }
  0x3d   :  { %v113_v30 = vadd.f32 %v112_v20, %v111_v8  ;;  %v127_v31 = vsel %vm126_vm4, %v85_v12, %v125_v27 }
  0x3e   :  { %v129_v32 = vsel %vm128_vm5, %v92_v22, %v127_v31 }
  0x3f   :  { %324 = vmatpush3.bf16.msra.mxu0 %v323_v24  ;;  %v131_v33 = vsel %vm130_vm6, %v99_v25, %v129_v32  ;;  %v254_v24 = vld [vmem:[%s517_s2] ss:$0 sm:$0xff] }
  0x40   :  { %325 = vmatprep.subr.bf16.mxu0 %v419_v0  ;;  %v133_v35 = vsel %vm132_vm7, %v106_v26, %v131_v33 }
  0x41   :  { %v135_v14 = vsel %vm134_vm8, %v113_v30, %v133_v35 }
  0x42   :  { %v143_v15 = vmul.f32 0.0625, %v135_v14 }
  0x43   :  { %327 = vmatpush3.bf16.msra.mxu0 %v326_v23 }
  0x44   :  { %328 = vmatprep.subr.bf16.mxu0 %v419_v0 }
  0x47   :  { %330 = vmatpush3.bf16.msra.mxu0 %v329_v34 }
  0x4a   :  { %305 = vmatmul.mubr.f32.vlgmr.msra.gmra.mrb[0].mxu0 %v143_v15 }
 0x11d   :  { %v233_v36 = vpop.f32.mrb[0].mxu0 }
 0x11e   :  { %v234_v37 = vadd.f32 %v254_v24, %v233_v36  ;;  %v306_v38 = vpop.f32.mrb[1].mxu0 }
 0x120   :  { %237 = vst [vmem:[#allocation8] sm:$0xff] %v234_v37 }
 0x121   :  { %396 = shalt.err (!%p393_p6)
}
 0x122   :  { %s397_s18 = scalar_lea.hbm %s518_s3, 128 }
 0x123   :  { %p398_p7 = scmp.ne.s32.totalorder %s518_s3, %s397_s18  ;;  %p401_p8 = scmp.lt.u32.totalorder %s397_s18, %s518_s3 }
 0x125   :  { %p403_p9 = pnand %p401_p8, %p398_p7 }
 0x127   :  { %406 = shalt.err (!%p403_p9)
}
 0x128   :  { %247 = dma.vmem_to_hbm [thread:$0]  %s245_s14, 128, %s518_s3, [#allocation5]  }
 0x129   :  { %411 = dma.done.wait [#allocation5], 128  }
 0x12a   :  { %412 = vsyncadd [#allocation5], 4294967168 }
 0x12b   :  { %251 = vsyncpa [#allocation4], 1 }
 0x12c   :  { %252 = vsyncpa [#allocation7], 1 }
 0x12d   :  { %253 = vsyncpa [#allocation5], 1 }

</bundles_post_ra>
